<compile_context>
chip_gen: v5e
topology: v5e:2x2
jax: 0.10.0
libtpu: 0.0.40
codegen_flags: <defaults>
</compile_context>

<pallas_src>
import functools
import math

import jax
import jax.numpy as jnp
from jax import lax
from jax.experimental import pallas as pl
from jax.experimental.pallas import tpu as pltpu

_VMEM_LIMIT = 48 * 1024 * 1024  # safely below v7x's 64 MiB physical VMEM


def _pick_tile(n: int, max_tile: int = 512) -> int:
    """Largest tile <= max_tile that divides n (keeping TPU-friendly multiples),
    else the full dimension (full dims always satisfy the (8,128) block rule)."""
    for c in (512, 256, 128, 64, 32, 16):
        if c <= max_tile and c <= n and n % c == 0:
            return c
    return n


# ----------------------------------------------------------------------------
# Kernel 1: fused QKV projection (shared input):  [Q|K|V] = x @ [Wq|Wk|Wv] + b
# ----------------------------------------------------------------------------
def _qkv_fused_kernel(x_ref, w_ref, b_ref, q_ref, k_ref, v_ref, *, H):
    x = x_ref[...].astype(w_ref.dtype)                       # (TM, E)
    y = jnp.dot(x, w_ref[...], preferred_element_type=jnp.float32)
    y = y + b_ref[...]                                        # (TM, 3H) f32
    q_ref[...] = y[:, 0:H].astype(q_ref.dtype)
    k_ref[...] = y[:, H:2 * H].astype(k_ref.dtype)
    v_ref[...] = y[:, 2 * H:3 * H].astype(v_ref.dtype)


def pallas_qkv_fused(x, w_qkv, b_qkv, hidden, out_dtype):
    N, L, E = x.shape
    NL = N * L
    TM = _pick_tile(NL)
    kernel = functools.partial(_qkv_fused_kernel, H=hidden)
    q, k, v = pl.pallas_call(
        kernel,
        out_shape=tuple(jax.ShapeDtypeStruct((NL, hidden), out_dtype) for _ in range(3)),
        grid=(NL // TM,),
        in_specs=[
            pl.BlockSpec((TM, E), lambda i: (i, 0)),
            pl.BlockSpec((E, 3 * hidden), lambda i: (0, 0)),
            pl.BlockSpec((1, 3 * hidden), lambda i: (0, 0)),
        ],
        out_specs=tuple(pl.BlockSpec((TM, hidden), lambda i: (i, 0)) for _ in range(3)),
        compiler_params=pltpu.CompilerParams(
            dimension_semantics=("parallel",), vmem_limit_bytes=_VMEM_LIMIT),
    )(x.reshape(NL, E), w_qkv, b_qkv)
    return (q.reshape(N, L, hidden), k.reshape(N, L, hidden), v.reshape(N, L, hidden))


# ----------------------------------------------------------------------------
# Kernel 2: generic row-tiled linear  y = x @ W + b  (cross-attention fallback)
# ----------------------------------------------------------------------------
def _linear_kernel(x_ref, w_ref, b_ref, o_ref):
    x = x_ref[...].astype(w_ref.dtype)
    y = jnp.dot(x, w_ref[...], preferred_element_type=jnp.float32) + b_ref[...]
    o_ref[...] = y.astype(o_ref.dtype)


def pallas_linear(x, w, b, out_dtype):
    N, L, E = x.shape
    NL, Ho = N * L, w.shape[1]
    TM = _pick_tile(NL)
    out = pl.pallas_call(
        _linear_kernel,
        out_shape=jax.ShapeDtypeStruct((NL, Ho), out_dtype),
        grid=(NL // TM,),
        in_specs=[
            pl.BlockSpec((TM, E), lambda i: (i, 0)),
            pl.BlockSpec((E, Ho), lambda i: (0, 0)),
            pl.BlockSpec((1, Ho), lambda i: (0, 0)),
        ],
        out_specs=pl.BlockSpec((TM, Ho), lambda i: (i, 0)),
        compiler_params=pltpu.CompilerParams(
            dimension_semantics=("parallel",), vmem_limit_bytes=_VMEM_LIMIT),
    )(x.reshape(NL, E), w, b)
    return out.reshape(N, L, Ho)


# ----------------------------------------------------------------------------
# Kernel 3: attention (all heads per query tile) fused with the output projection
#           out = sum_h softmax(Q_h K_h^T) V_h @ Wo_h  + bo
# ----------------------------------------------------------------------------
def _attn_out_kernel(*refs, heads, has_mask):
    if has_mask:
        q_ref, k_ref, v_ref, m_ref, wo_ref, bo_ref, o_ref = refs
    else:
        q_ref, k_ref, v_ref, wo_ref, bo_ref, o_ref = refs
        m_ref = None

    q = q_ref[0]                      # (TQ, H) -- already pre-scaled by 1/sqrt(dh)
    k = k_ref[0]                      # (Lk, H)
    v = v_ref[0]                      # (Lk, H)
    H = q.shape[-1]
    dh = H // heads
    keep = None if m_ref is None else (m_ref[0] != 0)        # (TQ, Lk) bool

    acc = None
    for h in range(heads):            # static unroll; per-head columns sliced in-register
        sl = slice(h * dh, (h + 1) * dh)
        # scores: contraction over dh on the trailing dims (no explicit k.T)
        s = lax.dot_general(q[:, sl], k[:, sl],
                            dimension_numbers=(((1,), (1,)), ((), ())),
                            preferred_element_type=jnp.float32)   # (TQ, Lk) f32
        if keep is not None:
            s = jnp.where(keep, s, -1e9)
        s = s - jnp.max(s, axis=-1, keepdims=True)           # stable softmax (f32)
        p = jnp.exp(s)
        p = p * pl.reciprocal(jnp.sum(p, axis=-1, keepdims=True), approx=True)
        ctx_h = jnp.dot(p.astype(v.dtype), v[:, sl],
                        preferred_element_type=jnp.float32)       # (TQ, dh) f32
        # distribute the output projection over heads: ctx_h @ Wo[h*dh:(h+1)*dh, :]
        part = jnp.dot(ctx_h.astype(wo_ref.dtype), wo_ref[h],
                       preferred_element_type=jnp.float32)        # (TQ, H) f32
        acc = part if acc is None else acc + part

    o_ref[0] = (acc + bo_ref[...]).astype(o_ref.dtype)       # single lane-dense store


def pallas_attention_outproj(Q, K, V, M, Wo3, bo, heads):
    N, Lq, H = Q.shape
    Lk = K.shape[1]
    dh = H // heads
    TQ = _pick_tile(Lq)
    has_mask = M is not None
    kernel = functools.partial(_attn_out_kernel, heads=heads, has_mask=has_mask)

    in_specs = [
        pl.BlockSpec((1, TQ, H), lambda b, t: (b, t, 0)),     # Q query tile
        pl.BlockSpec((1, Lk, H), lambda b, t: (b, 0, 0)),     # K (full length, re-DMA only on new batch)
        pl.BlockSpec((1, Lk, H), lambda b, t: (b, 0, 0)),     # V (full length)
    ]
    args = [Q, K, V]
    if has_mask:
        in_specs.append(pl.BlockSpec((1, TQ, Lk), lambda b, t: (b, t, 0)))
        args.append(M)
    in_specs += [
        pl.BlockSpec((heads, dh, H), lambda b, t: (0, 0, 0)), # W_o, head-major
        pl.BlockSpec((1, H), lambda b, t: (0, 0)),            # b_o
    ]
    args += [Wo3, bo]

    return pl.pallas_call(
        kernel,
        out_shape=jax.ShapeDtypeStruct((N, Lq, H), jnp.float32),
        grid=(N, Lq // TQ),
        in_specs=in_specs,
        out_specs=pl.BlockSpec((1, TQ, H), lambda b, t: (b, t, 0)),
        compiler_params=pltpu.CompilerParams(
            dimension_semantics=("parallel", "parallel"),
            vmem_limit_bytes=_VMEM_LIMIT),
    )(*args)


# ----------------------------------------------------------------------------
# Module wrapper
# ----------------------------------------------------------------------------
class MultiHeadAttentionLayerPallas:
    def __init__(self, embed_size: int, hidden_size: int, heads: int, key,
                 use_bf16_matmul: bool = True):
        assert hidden_size % heads == 0
        self.embed_size = embed_size
        self.hidden_size = hidden_size
        self.heads = heads
        self.dh = hidden_size // heads
        self.mm_dtype = jnp.bfloat16 if use_bf16_matmul else jnp.float32

        ks = jax.random.split(key, 8)

        def init_linear(kw, kb, fan_in, fan_out):
            bound = 1.0 / math.sqrt(fan_in)      # torch.nn.Linear default init
            w = jax.random.uniform(kw, (fan_in, fan_out), jnp.float32, -bound, bound)
            b = jax.random.uniform(kb, (fan_out,), jnp.float32, -bound, bound)
            return w, b

        self.Wq, self.bq = init_linear(ks[0], ks[1], embed_size, hidden_size)
        self.Wk, self.bk = init_linear(ks[2], ks[3], embed_size, hidden_size)
        self.Wv, self.bv = init_linear(ks[4], ks[5], embed_size, hidden_size)
        self.Wo, self.bo = init_linear(ks[6], ks[7], hidden_size, hidden_size)

        # Kernel-side parameters (all prepared once at init, zero runtime cost):
        #   * 1/sqrt(dh) folded into W_q / b_q
        #   * QKV weights concatenated for the single fused projection dot
        #   * W_o reshaped head-major (heads, dh, H) for leading-axis indexing
        #   * MXU operands in bf16 (f32 accumulation); biases stay f32.
        scale = 1.0 / math.sqrt(self.dh)
        wq_s, bq_s = self.Wq * scale, self.bq * scale
        mm = self.mm_dtype
        self.Wqkv_k = jnp.concatenate([wq_s, self.Wk, self.Wv], axis=1).astype(mm)
        self.bqkv_k = jnp.concatenate([bq_s, self.bk, self.bv]).reshape(1, -1)
        self.Wq_k, self.bq_k = wq_s.astype(mm), bq_s.reshape(1, -1)
        self.Wk_k, self.bk_k = self.Wk.astype(mm), self.bk.reshape(1, -1)
        self.Wv_k, self.bv_k = self.Wv.astype(mm), self.bv.reshape(1, -1)
        self.Wo3_k = self.Wo.reshape(self.heads, self.dh, hidden_size).astype(mm)
        self.bo_k = self.bo.reshape(1, -1)

    def __call__(self, EP_q, EP_k, EP_v, M=None):
        H = self.hidden_size
        if EP_q is EP_k and EP_q is EP_v:
            # self-attention: one fused projection call, input read from HBM once
            Q, K, V = pallas_qkv_fused(EP_q, self.Wqkv_k, self.bqkv_k, H, self.mm_dtype)
        else:
            # cross-attention: inputs differ -> row-tiled projection per input
            Q = pallas_linear(EP_q, self.Wq_k, self.bq_k, self.mm_dtype)
            K = pallas_linear(EP_k, self.Wk_k, self.bk_k, self.mm_dtype)
            V = pallas_linear(EP_v, self.Wv_k, self.bv_k, self.mm_dtype)
        return pallas_attention_outproj(Q, K, V, M, self.Wo3_k, self.bo_k, self.heads)


# ----------------------------------------------------------------------------
# Pure-JAX reference (f32, for correctness check)
# ----------------------------------------------------------------------------
def reference_mha(layer, EP_q, EP_k, EP_v, M=None):
    with jax.default_matmul_precision("float32"):
        N, L, _ = EP_q.shape
        H, heads = layer.hidden_size, layer.heads
        dh = H // heads
        Q = EP_q @ layer.Wq + layer.bq
        K = EP_k @ layer.Wk + layer.bk
        V = EP_v @ layer.Wv + layer.bv

        def split(x):
            return x.reshape(N, L, heads, dh).transpose(0, 2, 1, 3)  # (N, h, L, dh)

        q, k, v = split(Q), split(K), split(V)
        s = jnp.einsum("nhqd,nhkd->nhqk", q, k) / math.sqrt(dh)
        if M is not None:
            s = jnp.where(M[:, None, :, :] == 0, -1e9, s)
        p = jax.nn.softmax(s, axis=-1)
        ctx = jnp.einsum("nhqk,nhkd->nhqd", p, v)
        ctx = ctx.transpose(0, 2, 1, 3).reshape(N, L, H)
        return ctx @ layer.Wo + layer.bo


if __name__ == "__main__":
    N, L, E, H, heads = 2, 8, 32, 32, 4
    key = jax.random.PRNGKey(0)
    k_param, k_x, k_k, k_v = jax.random.split(key, 4)

    layer = MultiHeadAttentionLayerPallas(E, H, heads, k_param, use_bf16_matmul=True)

    EP = jax.random.normal(k_x, (N, L, E), jnp.float32)
    # causal mask (1 = keep, 0 = masked); int8 keeps the O(N*L^2) mask DMA small
    M = jnp.tile(jnp.tril(jnp.ones((L, L), jnp.int8))[None], (N, 1, 1))

    # --- self-attention, masked (fused QKV path + masked attention kernel) ---
    out1 = jax.block_until_ready(layer(EP, EP, EP, M))
    ref1 = reference_mha(layer, EP, EP, EP, M)
    assert out1.shape == (N, L, H)
    assert jnp.allclose(out1, ref1, atol=5e-2, rtol=5e-2), "self-attention mismatch"

    # --- cross-attention, unmasked (separate projections + no-mask kernel) ---
    EP_k = jax.random.normal(k_k, (N, L, E), jnp.float32)
    EP_v = jax.random.normal(k_v, (N, L, E), jnp.float32)
    out2 = jax.block_until_ready(layer(EP, EP_k, EP_v, None))
    ref2 = reference_mha(layer, EP, EP_k, EP_v, None)
    assert out2.shape == (N, L, H)
    assert jnp.allclose(out2, ref2, atol=5e-2, rtol=5e-2), "cross-attention mismatch"

    print("KERNEL_OK")
</pallas_src>

<mosaic_0001>
module attributes {stable_mosaic.version = 11 : i64} {
  func.func @_qkv_fused_kernel(%arg0: i32, %arg1: memref<16x32xf32, #tpu.memory_space<vmem>>, %arg2: memref<32x96xbf16, #tpu.memory_space<vmem>>, %arg3: memref<1x96xf32, #tpu.memory_space<vmem>>, %arg4: memref<16x32xbf16, #tpu.memory_space<vmem>>, %arg5: memref<16x32xbf16, #tpu.memory_space<vmem>>, %arg6: memref<16x32xbf16, #tpu.memory_space<vmem>>) attributes {dimension_semantics = [#tpu.dimension_semantics<parallel>], iteration_bounds = array<i64: 1>, scalar_prefetch = 0 : i64, scratch_operands = 0 : i64, tpu.core_type = #tpu.core_type<tc>, window_params = [{transform_indices = @transform_0, window_bounds = array<i64: 16, 32>}, {pipeline_mode = #tpu.pipeline_mode<synchronous>, transform_indices = @transform_1, window_bounds = array<i64: 32, 96>}, {pipeline_mode = #tpu.pipeline_mode<synchronous>, transform_indices = @transform_2, window_bounds = array<i64: 1, 96>}, {transform_indices = @transform_3, window_bounds = array<i64: 16, 32>}, {transform_indices = @transform_4, window_bounds = array<i64: 16, 32>}, {transform_indices = @transform_5, window_bounds = array<i64: 16, 32>}]} {
    %c0 = arith.constant 0 : index
    %c0_0 = arith.constant 0 : index
    %0 = vector.load %arg1[%c0, %c0_0] : memref<16x32xf32, #tpu.memory_space<vmem>>, vector<16x32xf32>
    %1 = arith.truncf %0 : vector<16x32xf32> to vector<16x32xbf16>
    %c0_1 = arith.constant 0 : index
    %c0_2 = arith.constant 0 : index
    %2 = vector.load %arg2[%c0_1, %c0_2] : memref<32x96xbf16, #tpu.memory_space<vmem>>, vector<32x96xbf16>
    %cst = arith.constant dense<0.000000e+00> : vector<16x96xf32>
    %3 = tpu.matmul %1, %2, %cst {dimension_numbers = #tpu.dot_dimension_numbers<[1], [0], [0], [1], [0, 0, 1, 1], [], []>} : vector<16x32xbf16>, vector<32x96xbf16>, vector<16x96xf32> -> vector<16x96xf32>
    %c0_3 = arith.constant 0 : index
    %c0_4 = arith.constant 0 : index
    %4 = vector.load %arg3[%c0_3, %c0_4] : memref<1x96xf32, #tpu.memory_space<vmem>>, vector<1x96xf32>
    %5 = vector.broadcast %4 : vector<1x96xf32> to vector<16x96xf32>
    %6 = arith.addf %3, %5 : vector<16x96xf32>
    %7 = vector.extract_strided_slice %6 {offsets = [0, 0], sizes = [16, 32], strides = [1, 1]} : vector<16x96xf32> to vector<16x32xf32>
    %8 = arith.truncf %7 : vector<16x32xf32> to vector<16x32xbf16>
    %c0_5 = arith.constant 0 : index
    %c0_6 = arith.constant 0 : index
    %9 = vector.load %arg4[%c0_5, %c0_6] : memref<16x32xbf16, #tpu.memory_space<vmem>>, vector<16x32xbf16>
    tpu.vector_store %arg4[%c0_5, %c0_6], %8 {strides = array<i32>} : memref<16x32xbf16, #tpu.memory_space<vmem>>, vector<16x32xbf16>,
    %10 = vector.extract_strided_slice %6 {offsets = [0, 32], sizes = [16, 32], strides = [1, 1]} : vector<16x96xf32> to vector<16x32xf32>
    %11 = arith.truncf %10 : vector<16x32xf32> to vector<16x32xbf16>
    %c0_7 = arith.constant 0 : index
    %c0_8 = arith.constant 0 : index
    %12 = vector.load %arg5[%c0_7, %c0_8] : memref<16x32xbf16, #tpu.memory_space<vmem>>, vector<16x32xbf16>
    tpu.vector_store %arg5[%c0_7, %c0_8], %11 {strides = array<i32>} : memref<16x32xbf16, #tpu.memory_space<vmem>>, vector<16x32xbf16>,
    %13 = vector.extract_strided_slice %6 {offsets = [0, 64], sizes = [16, 32], strides = [1, 1]} : vector<16x96xf32> to vector<16x32xf32>
    %14 = arith.truncf %13 : vector<16x32xf32> to vector<16x32xbf16>
    %c0_9 = arith.constant 0 : index
    %c0_10 = arith.constant 0 : index
    %15 = vector.load %arg6[%c0_9, %c0_10] : memref<16x32xbf16, #tpu.memory_space<vmem>>, vector<16x32xbf16>
    tpu.vector_store %arg6[%c0_9, %c0_10], %14 {strides = array<i32>} : memref<16x32xbf16, #tpu.memory_space<vmem>>, vector<16x32xbf16>,
    return
  }
  func.func @transform_0(%arg0: i32) -> (i32, i32) {
    %c0_i32 = arith.constant 0 : i32
    %c0_i32_0 = arith.constant 0 : i32
    return %arg0, %c0_i32 : i32, i32
  }
  func.func @transform_1(%arg0: i32) -> (i32, i32) {
    %c0_i32 = arith.constant 0 : i32
    %c0_i32_0 = arith.constant 0 : i32
    %c0_i32_1 = arith.constant 0 : i32
    return %c0_i32, %c0_i32_0 : i32, i32
  }
  func.func @transform_2(%arg0: i32) -> (i32, i32) {
    %c0_i32 = arith.constant 0 : i32
    %c0_i32_0 = arith.constant 0 : i32
    %c0_i32_1 = arith.constant 0 : i32
    return %c0_i32, %c0_i32_0 : i32, i32
  }
  func.func @transform_3(%arg0: i32) -> (i32, i32) {
    %c0_i32 = arith.constant 0 : i32
    %c0_i32_0 = arith.constant 0 : i32
    return %arg0, %c0_i32 : i32, i32
  }
  func.func @transform_4(%arg0: i32) -> (i32, i32) {
    %c0_i32 = arith.constant 0 : i32
    %c0_i32_0 = arith.constant 0 : i32
    return %arg0, %c0_i32 : i32, i32
  }
  func.func @transform_5(%arg0: i32) -> (i32, i32) {
    %c0_i32 = arith.constant 0 : i32
    %c0_i32_0 = arith.constant 0 : i32
    return %arg0, %c0_i32 : i32, i32
  }
}

</mosaic_0001>

<bundles_post_ra>
// kernel: tpu_custom_call.1
= control target key start
LH: loop header
LB: loop body
LE: loop exit
PB: predicated region body
PF: predicated region fallthrough
CT: control target
= control target key end

     0   :  { %11 = vsyncpa [#allocation3], 0  ;;  %s399_s0 = inlined_call_operand.hbm [shape: f32[16,32], index: 0, kind: input, shape index: {}]   ;;  %s400_s1 = inlined_call_operand.hbm [shape: bf16[32,96], index: 1, kind: input, shape index: {}]   ;;  %s401_s2 = inlined_call_operand.vmem [shape: f32[1,96], index: 2, kind: input, shape index: {}]   ;;  %s402_s3 = inlined_call_operand.hbm [shape: bf16[16,32], index: 3, kind: output, shape index: {0}]   ;;  %s403_s4 = inlined_call_operand.hbm [shape: bf16[16,32], index: 4, kind: output, shape index: {1}]   ;;  %s404_s5 = inlined_call_operand.hbm [shape: bf16[16,32], index: 5, kind: output, shape index: {2}]  }
   0x1   :  { %12 = vsyncpa [#allocation6], 0 }
   0x2   :  { %13 = vsyncpa [#allocation4], 0 }
   0x3   :  { %14 = vsyncpa [#allocation9], 0  ;;  %s19_s20 = sshll.u32 %s399_s0, 4  ;;  %s321_s21 = smov [#allocation2]   ;;  %s20_s20 = int_to_ptr.hbm [resolvable:$true] %s19_s20 }
   0x4   :  { %s21_s22 = sshll.u32 %s321_s21, 4  ;;  %s32_s25 = sshll.u32 %s400_s1, 4  ;;  %s22_s22 = int_to_ptr.vmem [resolvable:$true] %s21_s22  ;;  %s33_s25 = int_to_ptr.hbm [resolvable:$true] %s32_s25 }
   0x5   :  { %s322_s26 = smov 128   ;;  %s323_s27 = smov 8  }
   0x6   :  { %27 = dma.hbm_to_vmem [thread:$0]  %s20_s20, 256, %s22_s22, [#allocation3], %s322_s26, %s322_s26, %s323_s27  }
   0x7   :  { %s324_s28 = smov [#allocation5]   ;;  %s325_s30 = smov 64  }
   0x8   :  { %s34_s29 = sshll.u32 %s324_s28, 4  ;;  %s326_s6 = smov 4   ;;  %s35_s29 = int_to_ptr.vmem [resolvable:$true] %s34_s29 }
   0x9   :  { %40 = dma.hbm_to_vmem [thread:$0]  %s33_s25, 256, %s35_s29, [#allocation6], %s325_s30, %s325_s30, %s326_s6  }
   0xa   :  { %313 = dma.done.wait [#allocation3], 256  }
   0xb   :  { %314 = vsyncadd [#allocation3], 4294967040 }
   0xc   :  { %315 = dma.done.wait [#allocation6], 256  }
   0xd   :  { %316 = vsyncadd [#allocation6], 4294967040  ;;  %v181_v0 = vld [vmem:[#allocation5 + $0x8] sm:$0xff]  ;;  %v180_v1 = vld [vmem:[#allocation5] sm:$0xff]  ;;  %vm75_vm0 = vcmask 261120   ;;  %vm95_vm1 = vcmask 257024  }
   0xe   :  { %85 = vmatpush.bf16.msra.mxu0 %v181_v0  ;;  %v52_v2 = vld [vmem:[#allocation2] sm:$0xff]  ;;  %v53_v3 = vld [vmem:[#allocation2 + $0x8] sm:$0xff]  ;;  %s327_s7 = smov 96   ;;  %s328_s8 = smov [#allocation7]  }
   0xf   :  { %v54_v4 = vpack.c.bf16 %v53_v3, %v52_v2  ;;  %v192_v5 = vld [vmem:[%s401_s2] ss:$0 sm:$0xff]  ;;  %s120_s9 = sshll.u32 %s328_s8, 4  ;;  %s122_s12 = sshll.u32 %s402_s3, 4  ;;  %s121_s9 = int_to_ptr.vmem [resolvable:$true] %s120_s9  ;;  %s123_s12 = int_to_ptr.hbm [resolvable:$true] %s122_s12 }
  0x10   :  { %s329_s2 = smov [#allocation8]   ;;  %s135_s15 = sshll.u32 %s403_s4, 4  ;;  %s136_s15 = int_to_ptr.hbm [resolvable:$true] %s135_s15 }
  0x11   :  { %s133_s3 = sshll.u32 %s329_s2, 4  ;;  %s330_s16 = smov [#allocation10]   ;;  %s134_s3 = int_to_ptr.vmem [resolvable:$true] %s133_s3 }
  0x12   :  { %86 = vmatpush.bf16.msra.mxu0 %v180_v1  ;;  %s146_s17 = sshll.u32 %s330_s16, 4  ;;  %s148_s20 = sshll.u32 %s404_s5, 4  ;;  %s147_s17 = int_to_ptr.vmem [resolvable:$true] %s146_s17  ;;  %s149_s20 = int_to_ptr.hbm [resolvable:$true] %s148_s20 }
  0x15   :  { %179 = vmatmul.msk.bf16.vlgmr.msra.gmra.mxu0 %vm75_vm0, %v54_v4 }
  0x92   :  { %v88_v6 = vpop.f32.mrf.mxu0 }
  0x93   :  { %v89_v7 = vadd.f32 %v192_v5, %v88_v6 }
  0x95   :  { %v93_v8 = vpack.c.bf16 %v89_v7, %v89_v7 }
  0x97   :  { %96 = vst.msk [vmem:[#allocation7] sm:$0xf] %vm95_vm1, %v93_v8  ;;  %108 = vrot.lane.b32.xlu1 %v93_v8, %s325_s30  ;;  %100 = vrot.lane.b32.xlu0 %v93_v8, %s327_s7 }
  0x9a   :  { %v90_v9 = vpop.f32.mrf.mxu0 }
  0x9b   :  { %v91_v10 = vadd.f32 %v192_v5, %v90_v9 }
  0x9d   :  { %v94_v11 = vpack.c.bf16 %v91_v10, %v91_v10 }
  0x9f   :  { %97 = vst.msk [vmem:[#allocation7 + $0x4] sm:$0xf] %vm95_vm1, %v94_v11  ;;  %110 = vrot.lane.b32.xlu1 %v94_v11, %s325_s30  ;;  %102 = vrot.lane.b32.xlu0 %v94_v11, %s327_s7 }
  0xa0   :  { %128 = dma.vmem_to_hbm [thread:$0]  %s121_s9, 128, %s123_s12, [#allocation4], %s325_s30, %s325_s30, %s326_s6  }
 0x109   :  { %v109_v12 = vpop.permute.xlu1 %108  ;;  %v101_v13 = vpop.permute.xlu0 %100 }
 0x10a   :  { %114 = vst.msk [vmem:[#allocation10] sm:$0xf] %vm95_vm1, %v109_v12 }
 0x10b   :  { %106 = vst.msk [vmem:[#allocation8] sm:$0xf] %vm95_vm1, %v101_v13 }
 0x111   :  { %v111_v14 = vpop.permute.xlu1 %110  ;;  %v103_v15 = vpop.permute.xlu0 %102 }
 0x112   :  { %115 = vst.msk [vmem:[#allocation10 + $0x4] sm:$0xf] %vm95_vm1, %v111_v14 }
 0x113   :  { %107 = vst.msk [vmem:[#allocation8 + $0x4] sm:$0xf] %vm95_vm1, %v103_v15 }
 0x114   :  { %141 = dma.vmem_to_hbm [thread:$0]  %s134_s3, 128, %s136_s15, [#allocation9], %s325_s30, %s325_s30, %s326_s6  }
 0x115   :  { %154 = dma.vmem_to_hbm [thread:$0]  %s147_s17, 128, %s149_s20, [#allocation9], %s325_s30, %s325_s30, %s326_s6  }
 0x116   :  { %317 = dma.done.wait [#allocation4], 128  }
 0x117   :  { %318 = vsyncadd [#allocation4], 4294967168 }
 0x118   :  { %319 = dma.done.wait [#allocation9], 256  }
 0x119   :  { %320 = vsyncadd [#allocation9], 4294967040 }
 0x11a   :  { %167 = vsyncpa [#allocation3], 1 }
 0x11b   :  { %168 = vsyncpa [#allocation6], 1 }
 0x11c   :  { %169 = vsyncpa [#allocation4], 1 }
 0x11d   :  { %170 = vsyncpa [#allocation9], 1 }

</bundles_post_ra>
